<compile_context>
chip_gen: v5e
topology: v5e:2x2
jax: 0.10.0
libtpu: 0.0.40
codegen_flags: <defaults>
</compile_context>

<pallas_src>
import functools

import jax
import jax.numpy as jnp
from jax.experimental import pallas as pl
from jax.experimental.pallas import tpu as pltpu


def _abmil_kernel(x_ref, w1_ref, b1_ref, w2_ref, out_ref, *, approx_recip):
    # x_ref : (TB, N, D) compute dtype (bf16 or f32)
    # w1_ref: (D, H)     compute dtype
    # b1_ref: (1, H)     f32
    # w2_ref: (1, H)     f32   (second Linear's weight as a row; bias dropped)
    # out_ref: (TB, D)   output dtype
    TB, N, D = x_ref.shape
    H = w1_ref.shape[1]

    x = x_ref[...]                                    # (TB, N, D)
    x2d = x.reshape(TB * N, D)                        # merge bags -> big MXU M dim

    # Linear(D->H) on the MXU with f32 accumulation; tanh in f32.
    h = jnp.tanh(
        jnp.dot(x2d, w1_ref[...], preferred_element_type=jnp.float32)
        + b1_ref[...]
    )                                                 # (TB*N, H) f32

    # Linear(H->1): broadcast-multiply + lane reduce (VPU/XLU), no 1-lane MXU pass.
    h3 = h.reshape(TB, N, H)
    s = jnp.sum(h3 * w2_ref[...], axis=-1)            # (TB, N) f32

    # Numerically-stable softmax over the instance axis, per bag.
    m = jnp.max(s, axis=-1, keepdims=True)            # (TB, 1)
    e = jnp.exp(s - m)                                # (TB, N)
    denom = jnp.sum(e, axis=-1, keepdims=True)        # (TB, 1)
    a = e * pl.reciprocal(denom, approx=approx_recip)  # (TB, N)

    # Attention-weighted sum over instances: broadcast over D, reduce over N.
    out = jnp.sum(a.reshape(TB, N, 1) * x.astype(jnp.float32), axis=1)  # (TB, D)
    out_ref[...] = out.astype(out_ref.dtype)


def abmil_pooling(x, w1, b1, w2, b2=None, *, compute_dtype=jnp.bfloat16,
                  bags_per_step=None):
    """ABMIL pooling. x: (B, N, D). Returns (B, D) in x.dtype.

    b2 is accepted for API parity with nn.Linear but is mathematically
    irrelevant (softmax over instances is shift-invariant) and not used.
    """
    del b2  # shift-invariant under softmax over the instance axis
    B, N, D = x.shape
    H = w1.shape[1]
    out_dtype = x.dtype

    x_c = x.astype(compute_dtype)
    w1_c = w1.astype(compute_dtype)
    b1_row = b1.reshape(1, H).astype(jnp.float32)
    w2_row = w2.reshape(1, H).astype(jnp.float32)

    itemsize_c = jnp.dtype(compute_dtype).itemsize

    # --- choose bags-per-step (TB): fill the MXU M dim (~512 rows target),
    #     but keep two buffered x tiles well inside v7x's 64 MiB VMEM.
    if bags_per_step is None:
        target_rows = 512
        tb = max(1, target_rows // max(N, 1))
        bytes_per_bag = max(1, N * D * itemsize_c)
        tb = min(tb, max(1, (24 << 20) // (2 * bytes_per_bag)))
    else:
        tb = int(bags_per_step)

    if tb >= B:
        tb = B                                # single step over the full batch
    else:
        tb = max(8, (tb // 8) * 8)            # keep (TB, D) output block sublane-aligned

    # Pad the batch so the grid tiles it evenly (padded bags produce garbage
    # rows that are sliced off; bags never mix, so valid outputs are unaffected).
    B_pad = ((B + tb - 1) // tb) * tb
    if B_pad != B:
        x_c = jnp.pad(x_c, ((0, B_pad - B), (0, 0), (0, 0)))
    grid = (B_pad // tb,)

    # TODO(synk): for bags where a single (N, D) slab exceeds the VMEM budget
    # (large N*D on v7x), add an N-chunked grid axis with online-softmax
    # accumulators (pl.when init/finalize) instead of one-shot softmax.

    # --- VMEM limit sized to the chosen tile (double-buffered) + intermediates.
    x_tile_bytes = tb * N * D * itemsize_c
    out_tile_bytes = tb * D * jnp.dtype(out_dtype).itemsize
    weight_bytes = D * H * itemsize_c + 2 * H * 4
    f32_scratch = tb * N * (H + D + 4) * 4
    vmem_limit = int(min(
        max(32 << 20,
            2 * (x_tile_bytes + out_tile_bytes) + weight_bytes + f32_scratch + (4 << 20)),
        64 << 20))

    cost = pl.CostEstimate(
        flops=2 * B * N * D * H + 2 * B * N * H + 2 * B * N * D,
        transcendentals=B * N * (H + 1),          # tanh + exp
        bytes_accessed=(B * N * D * itemsize_c
                        + D * H * itemsize_c
                        + B * D * jnp.dtype(out_dtype).itemsize),
    )

    kernel = functools.partial(
        _abmil_kernel,
        # approx reciprocal (EUP vrcp) on the bf16 fast path; exact for f32.
        approx_recip=(jnp.dtype(compute_dtype) != jnp.dtype(jnp.float32)),
    )

    out = pl.pallas_call(
        kernel,
        out_shape=jax.ShapeDtypeStruct((B_pad, D), out_dtype),
        grid_spec=pltpu.PrefetchScalarGridSpec(
            num_scalar_prefetch=0,
            grid=grid,
            in_specs=[
                pl.BlockSpec((tb, N, D), lambda b: (b, 0, 0)),  # x: TB bags / step
                pl.BlockSpec((D, H), lambda b: (0, 0)),         # W1 (resident)
                pl.BlockSpec((1, H), lambda b: (0, 0)),         # b1
                pl.BlockSpec((1, H), lambda b: (0, 0)),         # W2 row
            ],
            out_specs=pl.BlockSpec((tb, D), lambda b: (b, 0)),
        ),
        compiler_params=pltpu.CompilerParams(
            dimension_semantics=("parallel",),
            vmem_limit_bytes=vmem_limit,
        ),
        cost_estimate=cost,
    )(x_c, w1_c, b1_row, w2_row)

    return out[:B] if B_pad != B else out


def _reference(x, w1, b1, w2, b2):
    s = jnp.tanh(x @ w1 + b1) @ w2 + b2          # (B, N, 1)
    a = jax.nn.softmax(s, axis=1)                # (B, N, 1)
    attn_w = jnp.swapaxes(a, -1, -2)             # (B, 1, N)
    return (attn_w @ x)[:, 0, :]                 # (B, D)


if __name__ == "__main__":
    # Small shapes consistent with the module: batch=2, bag_size(N)=8,
    # input_dim(D)=32, hidden_dim(H)=16.
    B, N, D, H = 2, 8, 32, 16

    key = jax.random.PRNGKey(0)
    kx, kw1, kb1, kw2, kb2 = jax.random.split(key, 5)

    x = jax.random.normal(kx, (B, N, D), dtype=jnp.float32)

    lim1 = 1.0 / jnp.sqrt(jnp.float32(D))
    lim2 = 1.0 / jnp.sqrt(jnp.float32(H))
    w1 = jax.random.uniform(kw1, (D, H), jnp.float32, -lim1, lim1)
    b1 = jax.random.uniform(kb1, (H,), jnp.float32, -lim1, lim1)
    w2 = jax.random.uniform(kw2, (H, 1), jnp.float32, -lim2, lim2)
    b2 = jax.random.uniform(kb2, (1,), jnp.float32, -lim2, lim2)

    # 1) f32 compute path: exact check against the full-precision reference.
    out_f32 = jax.block_until_ready(
        abmil_pooling(x, w1, b1, w2, b2, compute_dtype=jnp.float32))
    ref_f32 = _reference(x, w1, b1, w2, b2)
    assert out_f32.shape == (B, D)
    assert jnp.allclose(out_f32, ref_f32, atol=1e-5, rtol=1e-5)

    # 2) bf16 fast path (default): compare against a reference fed the same
    #    bf16-quantized x / W1 so only accumulation order / approx-recip differ.
    out_bf16 = jax.block_until_ready(abmil_pooling(x, w1, b1, w2, b2))
    x_q = x.astype(jnp.bfloat16).astype(jnp.float32)
    w1_q = w1.astype(jnp.bfloat16).astype(jnp.float32)
    ref_bf16 = _reference(x_q, w1_q, b1, w2, b2)
    assert out_bf16.shape == (B, D)
    assert jnp.allclose(out_bf16, ref_bf16, atol=1e-2, rtol=1e-2)

    print("KERNEL_OK")
</pallas_src>

<mosaic_0001>
module attributes {stable_mosaic.version = 11 : i64} {
  func.func @_abmil_kernel(%arg0: i32, %arg1: memref<2x8x32xf32, #tpu.memory_space<vmem>>, %arg2: memref<32x16xf32, #tpu.memory_space<vmem>>, %arg3: memref<1x16xf32, #tpu.memory_space<vmem>>, %arg4: memref<1x16xf32, #tpu.memory_space<vmem>>, %arg5: memref<2x32xf32, #tpu.memory_space<vmem>>) attributes {dimension_semantics = [#tpu.dimension_semantics<parallel>], iteration_bounds = array<i64: 1>, scalar_prefetch = 0 : i64, scratch_operands = 0 : i64, tpu.core_type = #tpu.core_type<tc>, window_params = [{transform_indices = @transform_0, window_bounds = array<i64: 2, 8, 32>}, {pipeline_mode = #tpu.pipeline_mode<synchronous>, transform_indices = @transform_1, window_bounds = array<i64: 32, 16>}, {pipeline_mode = #tpu.pipeline_mode<synchronous>, transform_indices = @transform_2, window_bounds = array<i64: 1, 16>}, {pipeline_mode = #tpu.pipeline_mode<synchronous>, transform_indices = @transform_3, window_bounds = array<i64: 1, 16>}, {transform_indices = @transform_4, window_bounds = array<i64: 2, 32>}]} {
    %c0 = arith.constant 0 : index
    %c0_0 = arith.constant 0 : index
    %c0_1 = arith.constant 0 : index
    %0 = vector.load %arg1[%c0, %c0_0, %c0_1] : memref<2x8x32xf32, #tpu.memory_space<vmem>>, vector<2x8x32xf32>
    %1 = vector.shape_cast %0 : vector<2x8x32xf32> to vector<16x32xf32>
    %c0_2 = arith.constant 0 : index
    %c0_3 = arith.constant 0 : index
    %2 = vector.load %arg2[%c0_2, %c0_3] : memref<32x16xf32, #tpu.memory_space<vmem>>, vector<32x16xf32>
    %cst = arith.constant dense<0.000000e+00> : vector<16x16xf32>
    %3 = tpu.matmul %1, %2, %cst {dimension_numbers = #tpu.dot_dimension_numbers<[1], [0], [0], [1], [0, 0, 1, 1], [], []>} : vector<16x32xf32>, vector<32x16xf32>, vector<16x16xf32> -> vector<16x16xf32>
    %c0_4 = arith.constant 0 : index
    %c0_5 = arith.constant 0 : index
    %4 = vector.load %arg3[%c0_4, %c0_5] : memref<1x16xf32, #tpu.memory_space<vmem>>, vector<1x16xf32>
    %5 = vector.broadcast %4 : vector<1x16xf32> to vector<16x16xf32>
    %6 = arith.addf %3, %5 : vector<16x16xf32>
    %7 = math.tanh %6 : vector<16x16xf32>
    %8 = vector.shape_cast %7 : vector<16x16xf32> to vector<2x8x16xf32>
    %c0_6 = arith.constant 0 : index
    %c0_7 = arith.constant 0 : index
    %9 = vector.load %arg4[%c0_6, %c0_7] : memref<1x16xf32, #tpu.memory_space<vmem>>, vector<1x16xf32>
    %10 = vector.shape_cast %9 : vector<1x16xf32> to vector<1x1x16xf32>
    %11 = vector.broadcast %10 : vector<1x1x16xf32> to vector<2x8x16xf32>
    %12 = arith.mulf %8, %11 : vector<2x8x16xf32>
    %cst_8 = arith.constant dense<0.000000e+00> : vector<2x8xf32>
    %13 = vector.multi_reduction <add>, %12, %cst_8 [2] : vector<2x8x16xf32> to vector<2x8xf32>
    %cst_9 = arith.constant dense<0xFF800000> : vector<2xf32>
    %14 = vector.multi_reduction <maximumf>, %13, %cst_9 [1] : vector<2x8xf32> to vector<2xf32>
    %15 = vector.shape_cast %14 : vector<2xf32> to vector<2x1xf32>
    %16 = vector.broadcast %15 : vector<2x1xf32> to vector<2x8xf32>
    %17 = arith.subf %13, %16 : vector<2x8xf32>
    %18 = math.exp %17 : vector<2x8xf32>
    %cst_10 = arith.constant dense<0.000000e+00> : vector<2xf32>
    %19 = vector.multi_reduction <add>, %18, %cst_10 [1] : vector<2x8xf32> to vector<2xf32>
    %20 = vector.shape_cast %19 : vector<2xf32> to vector<2x1xf32>
    %21 = tpu.reciprocal %20 : vector<2x1xf32> -> vector<2x1xf32>
    %22 = vector.broadcast %21 : vector<2x1xf32> to vector<2x8xf32>
    %23 = arith.mulf %18, %22 : vector<2x8xf32>
    %24 = vector.shape_cast %23 : vector<2x8xf32> to vector<2x8x1xf32>
    %25 = vector.broadcast %24 : vector<2x8x1xf32> to vector<2x8x32xf32>
    %26 = arith.mulf %25, %0 : vector<2x8x32xf32>
    %cst_11 = arith.constant dense<0.000000e+00> : vector<2x32xf32>
    %27 = vector.multi_reduction <add>, %26, %cst_11 [1] : vector<2x8x32xf32> to vector<2x32xf32>
    %c0_12 = arith.constant 0 : index
    %c0_13 = arith.constant 0 : index
    %28 = vector.load %arg5[%c0_12, %c0_13] : memref<2x32xf32, #tpu.memory_space<vmem>>, vector<2x32xf32>
    tpu.vector_store %arg5[%c0_12, %c0_13], %27 {strides = array<i32>} : memref<2x32xf32, #tpu.memory_space<vmem>>, vector<2x32xf32>,
    return
  }
  func.func @transform_0(%arg0: i32) -> (i32, i32, i32) {
    %c0_i32 = arith.constant 0 : i32
    %c0_i32_0 = arith.constant 0 : i32
    %c0_i32_1 = arith.constant 0 : i32
    return %arg0, %c0_i32, %c0_i32_0 : i32, i32, i32
  }
  func.func @transform_1(%arg0: i32) -> (i32, i32) {
    %c0_i32 = arith.constant 0 : i32
    %c0_i32_0 = arith.constant 0 : i32
    %c0_i32_1 = arith.constant 0 : i32
    return %c0_i32, %c0_i32_0 : i32, i32
  }
  func.func @transform_2(%arg0: i32) -> (i32, i32) {
    %c0_i32 = arith.constant 0 : i32
    %c0_i32_0 = arith.constant 0 : i32
    %c0_i32_1 = arith.constant 0 : i32
    return %c0_i32, %c0_i32_0 : i32, i32
  }
  func.func @transform_3(%arg0: i32) -> (i32, i32) {
    %c0_i32 = arith.constant 0 : i32
    %c0_i32_0 = arith.constant 0 : i32
    %c0_i32_1 = arith.constant 0 : i32
    return %c0_i32, %c0_i32_0 : i32, i32
  }
  func.func @transform_4(%arg0: i32) -> (i32, i32) {
    %c0_i32 = arith.constant 0 : i32
    %c0_i32_0 = arith.constant 0 : i32
    return %arg0, %c0_i32 : i32, i32
  }
}

</mosaic_0001>

<bundles_post_ra>
// kernel: tpu_custom_call.1
= control target key start
LH: loop header
LB: loop body
LE: loop exit
PB: predicated region body
PF: predicated region fallthrough
CT: control target
= control target key end

     0   :  { %s301_s0 = inlined_call_operand.vmem [shape: f32[2,8,32], index: 0, kind: input, shape index: {}]   ;;  %s302_s1 = inlined_call_operand.vmem [shape: f32[32,16], index: 1, kind: input, shape index: {}]   ;;  %s303_s2 = inlined_call_operand.vmem [shape: f32[1,16], index: 2, kind: input, shape index: {}]   ;;  %s304_s3 = inlined_call_operand.vmem [shape: f32[1,16], index: 3, kind: input, shape index: {}]   ;;  %s305_s4 = inlined_call_operand.hbm [shape: f32[2,32], index: 4, kind: output, shape index: {}]  }
   0x1   :  { %v23_v0 = vld [vmem:[%s302_s1 + $0x18] sm:$0xff]  ;;  %v22_v1 = vld [vmem:[%s302_s1 + $0x10] sm:$0xff]  ;;  %v21_v2 = vld [vmem:[%s302_s1 + $0x8] sm:$0xff] }
   0x2   :  { %47 = vmatpush.msra.mxu0 %v23_v0  ;;  %183 = vmatpush.msra.mxu1 %v23_v0 }
   0x4   :  { %48 = vmatpush.msra.mxu0 %v22_v1  ;;  %184 = vmatpush.msra.mxu1 %v22_v1 }
   0x5   :  { %9 = vsyncpa [#allocation3], 0  ;;  %v20_v3 = vld [vmem:[%s302_s1] sm:$0xff]  ;;  %vm28_vm0 = vcmask 261120   ;;  %v277_v5 = vld [vmem:[%s301_s0 + $0x8] sm:$0xff]  ;;  %vm66_vm1 = vcmask 130048   ;;  %v75_v19 = vlaneseq }
   0x6   :  { %49 = vmatpush.msra.mxu0 %v21_v2  ;;  %v272_v4 = vld [vmem:[%s301_s0] sm:$0xff]  ;;  %185 = vmatpush.msra.mxu1 %v21_v2  ;;  %vm79_vm2 = vcmask 1041409   ;;  %vm82_vm3 = vcmask 58368   ;;  %v230_v26 = vmov 0   ;;  %s172_s5 = sshll.u32 %s305_s4, 4  ;;  %vm163_vm8 = vcmask 254976   ;;  %s173_s5 = int_to_ptr.hbm [resolvable:$true] %s172_s5 }
   0x7   :  { %v192_v6 = vld [vmem:[%s303_s2] ss:$0 sm:$0xff]  ;;  %v76_v20 = vand.u32 127, %v75_v19  ;;  %190 = vset.pattern.permute.xlu2 %v230_v26  ;;  %189 = vset.pattern.permute.xlu1 %v230_v26  ;;  %s231_s2 = smov [#allocation2]  }
   0x8   :  { %50 = vmatpush.msra.mxu0 %v20_v3  ;;  %186 = vmatpush.msra.mxu1 %v20_v3  ;;  %v193_v11 = vld [vmem:[%s304_s3] ss:$0 sm:$0xff]  ;;  %s170_s3 = sshll.u32 %s231_s2, 4  ;;  %s171_s3 = int_to_ptr.vmem [resolvable:$true] %s170_s3 }
   0x9   :  { %181 = vmatmul.msk.f32.vlgmr.msra.gmra.mxu0 %vm28_vm0, %v272_v4  ;;  %182 = vmatmul.msk.f32.vlgmr.msra.gmra.mxu1 %vm28_vm0, %v277_v5 }
   0xa   :  { %191 = vset.pattern.permute.xlu0 %v230_v26 }
  0x86   :  { %v52_v7 = vpop.f32.mrf.mxu0  ;;  %v55_v8 = vpop.f32.mrf.mxu1 }
  0x87   :  { %v53_v9 = vadd.f32 %v192_v6, %v52_v7  ;;  %v56_v10 = vadd.f32 %v192_v6, %v55_v8 }
  0x89   :  { %194 = vtanh.f32 %v53_v9 }
  0x8a   :  { %196 = vtanh.f32 %v56_v10 }
  0x8f   :  { %v195_v12 = vpop.eup %194 }
  0x90   :  { %v64_v13 = vmul.f32 %v195_v12, %v193_v11  ;;  %v197_v14 = vpop.eup %196 }
  0x91   :  { %v65_v16 = vmul.f32 %v197_v14, %v193_v11 }
  0x92   :  { %v67_v15 = vsel %vm66_vm1, %v64_v13, 0.0 }
  0x93   :  { %68 = vadd.xlane.f32.xlu0 %v67_v15  ;;  %v70_v17 = vsel %vm66_vm1, %v65_v16, 0.0 }
  0x9b   :  { %71 = vadd.xlane.f32.xlu0 %v70_v17 }
 0x106   :  { %v69_v18 = vpop.xlane.xlu0 %68 }
 0x107   :  { %v77_v22 = vperm.slane %v69_v18, %v76_v20 }
 0x10e   :  { %v72_v21 = vpop.xlane.xlu0 %71 }
 0x10f   :  { %v78_v23 = vperm.slane %v72_v21, %v76_v20 }
 0x111   :  { %v80_v24 = vsel %vm79_vm2, %v78_v23, %v77_v22 }
 0x112   :  { %v83_v25 = vsel %vm82_vm3, %v80_v24, -inf }
 0x113   :  { %84 = vmax.xlane.f32.xlu1 %v83_v25 }
 0x186   :  { %v85_v27 = vpop.xlane.xlu1 %84 }
 0x187   :  { %v87_v28 = vperm.slane %v85_v27, 0  ;;  %v88_v29 = vperm.slane %v85_v27, 1 }
 0x189   :  { %v91_v30 = vsub.f32 %v69_v18, %v87_v28  ;;  %v92_v31 = vsub.f32 %v72_v21, %v88_v29 }
 0x18b   :  { %v93_v32 = vmul.f32 1.442695, %v91_v30  ;;  %v95_v33 = vmul.f32 1.442695, %v92_v31 }
 0x18d   :  { %198 = vpow2.f32 %v93_v32 }
 0x18e   :  { %200 = vpow2.f32 %v95_v33 }
 0x193   :  { %v199_v34 = vpop.eup %198 }
 0x194   :  { %v201_v35 = vpop.eup %200  ;;  %100 = vperm.xlu1 %189, %v199_v34  }
 0x195   :  { %103 = vperm.xlu2 %190, %v201_v35  }
 0x1ef   :  { %v104_v36 = vpop.permute.xlu2 %103 }
 0x1f0   :  { %v106_v38 = vperm.slane %v104_v36, %v76_v20 }
 0x206   :  { %v101_v37 = vpop.permute.xlu1 %100 }
 0x207   :  { %v105_v39 = vperm.slane %v101_v37, %v76_v20 }
 0x209   :  { %v107_v40 = vsel %vm79_vm2, %v106_v38, %v105_v39 }
 0x20a   :  { %v109_v41 = vsel %vm82_vm3, %v107_v40, 0.0 }
 0x20b   :  { %110 = vadd.xlane.f32.xlu2 %v109_v41 }
 0x27e   :  { %v111_v42 = vpop.xlane.xlu2 %110 }
 0x27f   :  { %202 = vrcp.f32 %v111_v42  ;;  %v123_v46 = vand.u32 2147483648, %v111_v42  ;;  %v121_v48 = vand.u32 2147483647, %v111_v42  ;;  %vm117_vm5 = vweird.f32 %v111_v42 }
 0x281   :  { %v124_v50 = vor.u32 1.1754944e-38, %v123_v46  ;;  %vm122_vm7 = vcmp.eq.f32.partialorder %v121_v48, 8.507059e+37 }
 0x285   :  { %v203_v43 = vpop.eup %202 }
 0x286   :  { %v113_v44 = vmul.f32 %v203_v43, %v111_v42  ;;  %vm118_vm4 = vweird.f32 %v203_v43 }
 0x287   :  { %vm119_vm6 = vmor %vm117_vm5, %vm118_vm4 }
 0x288   :  { %v114_v45 = vsub.f32 1.0, %v113_v44 }
 0x28a   :  { %v115_v47 = vmul.f32 %v203_v43, %v114_v45 }
 0x28c   :  { %v116_v49 = vadd.f32 %v203_v43, %v115_v47 }
 0x28e   :  { %v120_v51 = vsel %vm119_vm6, %v203_v43, %v116_v49 }
 0x28f   :  { %v125_v52 = vsel %vm122_vm7, %v124_v50, %v120_v51 }
 0x290   :  { %v128_v53 = vperm.slane %v125_v52, 1  ;;  %v127_v54 = vperm.slane %v125_v52, 0 }
 0x292   :  { %v132_v55 = vmul.f32 %v201_v35, %v128_v53  ;;  %v131_v56 = vmul.f32 %v199_v34, %v127_v54 }
 0x294   :  { %140 = vperm.xlu1 %189, %v132_v55   ;;  %135 = vperm.xlu0 %191, %v131_v56  }
 0x306   :  { %v141_v57 = vpop.permute.xlu1 %140  ;;  %v136_v58 = vpop.permute.xlu0 %135 }
 0x307   :  { %v144_v59 = vmul.f32 %v141_v57, %v277_v5  ;;  %v143_v60 = vmul.f32 %v136_v58, %v272_v4 }
 0x309   :  { %v152_v61 = vsel %vm28_vm0, %v144_v59, 0.0  ;;  %v145_v62 = vsel %vm28_vm0, %v143_v60, 0.0 }
 0x30a   :  { %v153_v63 = vrot.slane %v152_v61, 4  ;;  %v146_v0 = vrot.slane %v145_v62, 4 }
 0x30c   :  { %v154_v1 = vadd.f32 %v153_v63, %v152_v61  ;;  %v147_v2 = vadd.f32 %v146_v0, %v145_v62 }
 0x30e   :  { %v155_v3 = vrot.slane %v154_v1, 2  ;;  %v148_v6 = vrot.slane %v147_v2, 2 }
 0x310   :  { %v156_v7 = vadd.f32 %v155_v3, %v154_v1  ;;  %v149_v8 = vadd.f32 %v148_v6, %v147_v2 }
 0x312   :  { %v157_v9 = vrot.slane %v156_v7, 1  ;;  %v150_v10 = vrot.slane %v149_v8, 1 }
 0x314   :  { %v158_v4 = vadd.f32 %v157_v9, %v156_v7  ;;  %v151_v5 = vadd.f32 %v150_v10, %v149_v8 }
 0x316   :  { %v161_v11 = vsel %vm79_vm2, %v158_v4, %v151_v5 }
 0x317   :  { %164 = vst.msk [vmem:[#allocation2] sm:$0x3] %vm163_vm8, %v161_v11 }
 0x318   :  { %175 = dma.vmem_to_hbm [thread:$0]  %s171_s3, 32, %s173_s5, [#allocation3]  }
 0x319   :  { %228 = dma.done.wait [#allocation3], 32  }
 0x31a   :  { %229 = vsyncadd [#allocation3], 4294967264 }
 0x31b   :  { %180 = vsyncpa [#allocation3], 1 }

</bundles_post_ra>
